<compile_context>
chip_gen: v7x
topology: tpu7x:2x2x1
jax: 0.10.0
libtpu: 0.0.40
codegen_flags: <defaults>
</compile_context>

<pallas_src>
import jax
import jax.numpy as jnp
from jax.experimental import pallas as pl
from jax.experimental.pallas import tpu as pltpu


def mlp_kernel(x_ref,
               w1_ref, b1_ref,
               w2_ref, b2_ref,
               w3_ref, b3_ref,
               w4_ref, b4_ref,
               w5_ref, b5_ref,
               o_ref):
    """Feature-major MLP: activations are (features, TILE_B), weights (out, in)."""

    def leaky(z):
        # mul + max (one VALU op fewer than compare + select)
        return jnp.maximum(z, 0.01 * z)

    def dense(w_ref, b_ref, h):
        # bf16 operands into the MXU, f32 accumulation, f32 bias.
        return jnp.dot(w_ref[...], h.astype(jnp.bfloat16),
                       preferred_element_type=jnp.float32) + b_ref[...]

    x = x_ref[...]                                          # (2, TILE_B), f32

    # Layer 1 (K=2): a matmul would use <2% of an MXU pass, so ride the VPU
    # with two broadcasted multiply-adds (outer-product style), all f32.
    h = (w1_ref[:, 0:1] * x[0:1, :] +
         w1_ref[:, 1:2] * x[1:2, :] +
         b1_ref[...])                                       # (64, TILE_B)
    h = leaky(h)

    # Layers 2-4: Linear (BN already folded into W/b) + LeakyReLU on the MXU.
    h = leaky(dense(w2_ref, b2_ref, h))
    h = leaky(dense(w3_ref, b3_ref, h))
    h = leaky(dense(w4_ref, b4_ref, h))

    # Final Linear (no BN / activation).
    o_ref[...] = dense(w5_ref, b5_ref, h)                   # (8, TILE_B)


def init_params(key, input_dim=2, output_dim=8):
    """Deterministic PyTorch-style init.  Weights stored (out, in) like nn.Linear."""
    dims = [input_dim, 64, 64, 64, 32, output_dim]
    params = {}
    for i in range(5):
        fan_in, fan_out = dims[i], dims[i + 1]
        key, kw, kb = jax.random.split(key, 3)
        bound = 1.0 / jnp.sqrt(jnp.float32(fan_in))
        params[f"w{i+1}"] = jax.random.uniform(
            kw, (fan_out, fan_in), jnp.float32, -bound, bound)
        params[f"b{i+1}"] = jax.random.uniform(
            kb, (fan_out,), jnp.float32, -bound, bound)
    # BatchNorm1d defaults: gamma=1, beta=0, running_mean=0, running_var=1
    for i, feat in zip(range(1, 5), [64, 64, 64, 32]):
        params[f"gamma{i}"] = jnp.ones((feat,), jnp.float32)
        params[f"beta{i}"] = jnp.zeros((feat,), jnp.float32)
        params[f"mean{i}"] = jnp.zeros((feat,), jnp.float32)
        params[f"var{i}"] = jnp.ones((feat,), jnp.float32)
    return params


def fold_bn(params, eps=1e-5):
    """Fold eval-mode BatchNorm1d into the preceding Linear.

    Returns [(W_fold (out,in), b_fold (out,1)) for each of the 5 layers], f32.
    """
    folded = []
    for i in range(1, 6):
        w = params[f"w{i}"]                    # (out, in)
        b = params[f"b{i}"]                    # (out,)
        if i <= 4:
            s = params[f"gamma{i}"] / jnp.sqrt(params[f"var{i}"] + eps)
            t = params[f"beta{i}"] - params[f"mean{i}"] * s
            w = w * s[:, None]
            b = b * s + t
        folded.append((w, b[:, None]))         # bias as (out, 1) column
    return folded


def _round_up(n, m):
    return ((n + m - 1) // m) * m


def neural_net_forward(x, params, *, tile_b=4096):
    """x: (B, input_dim) -> (B, output_dim).  Matches NeuralNet.forward (eval mode)."""
    B, in_dim = x.shape
    folded = fold_bn(params)
    out_dim = folded[-1][0].shape[0]

    # Feature-major layout: batch on the 128-lane axis.  Pad B only to a
    # multiple of 128; the grid handles a partial last tile via pl.cdiv.
    padded_b = _round_up(B, 128)
    xt = x.T.astype(jnp.float32)
    if padded_b != B:
        xt = jnp.pad(xt, ((0, 0), (0, padded_b - B)))       # single fused pad

    tile = min(tile_b, padded_b)                             # multiple of 128
    grid = (pl.cdiv(padded_b, tile),)

    # x / output stream through the grid; weights use a constant index_map so
    # Pallas keeps them resident in VMEM (no re-DMA per batch tile).
    x_spec = pl.BlockSpec((in_dim, tile), lambda i: (0, i))
    o_spec = pl.BlockSpec((out_dim, tile), lambda i: (0, i))

    weight_args = []
    weight_specs = []
    weight_bytes = 0
    for li, (w, b) in enumerate(folded):
        if li == 0:
            w_arg = w                                        # layer 1 on VPU, f32
        else:
            w_arg = w.astype(jnp.bfloat16)                   # MXU layers in bf16
        weight_args += [w_arg, b]
        weight_specs += [pl.BlockSpec(w_arg.shape, lambda i: (0, 0)),
                         pl.BlockSpec(b.shape, lambda i: (0, 0))]
        weight_bytes += w_arg.size * w_arg.dtype.itemsize + b.size * 4

    # flops/sample = 2*(2*64 + 64*64 + 64*64 + 64*32 + 32*8) = 21248
    cost = pl.CostEstimate(
        flops=21248 * padded_b,
        transcendentals=0,
        bytes_accessed=(in_dim + out_dim) * 4 * padded_b + weight_bytes)

    out_t = pl.pallas_call(
        mlp_kernel,
        out_shape=jax.ShapeDtypeStruct((out_dim, padded_b), jnp.float32),
        grid=grid,
        in_specs=[x_spec] + weight_specs,
        out_specs=o_spec,
        compiler_params=pltpu.CompilerParams(
            dimension_semantics=("parallel",),
            vmem_limit_bytes=32 * 1024 * 1024),
        cost_estimate=cost,
    )(xt, *weight_args)

    return out_t[:, :B].T


def reference_forward(x, params, eps=1e-5):
    """Pure-JAX reference (un-folded Linear + eval-mode BN + LeakyReLU), f32."""
    h = x
    for i in range(1, 5):
        z = h @ params[f"w{i}"].T + params[f"b{i}"]
        z = (z - params[f"mean{i}"]) / jnp.sqrt(params[f"var{i}"] + eps)
        z = z * params[f"gamma{i}"] + params[f"beta{i}"]
        h = jnp.where(z > 0, z, 0.01 * z)
    return h @ params["w5"].T + params["b5"]


if __name__ == "__main__":
    key = jax.random.PRNGKey(0)
    k_params, k_x = jax.random.split(key)

    params = init_params(k_params, input_dim=2, output_dim=8)
    x = jax.random.normal(k_x, (8, 2), jnp.float32)  # batch=8, input_dim=2

    out = neural_net_forward(x, params)
    jax.block_until_ready(out)

    ref = reference_forward(x, params)
    assert out.shape == (8, 8)
    # bf16 MXU operands (f32 accumulation) -> relaxed tolerance vs f32 reference.
    assert jnp.allclose(out, ref, atol=5e-2, rtol=5e-2), "mismatch vs reference"

    print("KERNEL_OK")
</pallas_src>

<mosaic_0001>
module attributes {stable_mosaic.version = 11 : i64} {
  func.func @mlp_kernel(%arg0: i32, %arg1: memref<2x128xf32, #tpu.memory_space<vmem>>, %arg2: memref<64x2xf32, #tpu.memory_space<vmem>>, %arg3: memref<64x1xf32, #tpu.memory_space<vmem>>, %arg4: memref<64x64xbf16, #tpu.memory_space<vmem>>, %arg5: memref<64x1xf32, #tpu.memory_space<vmem>>, %arg6: memref<64x64xbf16, #tpu.memory_space<vmem>>, %arg7: memref<64x1xf32, #tpu.memory_space<vmem>>, %arg8: memref<32x64xbf16, #tpu.memory_space<vmem>>, %arg9: memref<32x1xf32, #tpu.memory_space<vmem>>, %arg10: memref<8x32xbf16, #tpu.memory_space<vmem>>, %arg11: memref<8x1xf32, #tpu.memory_space<vmem>>, %arg12: memref<8x128xf32, #tpu.memory_space<vmem>>) attributes {dimension_semantics = [#tpu.dimension_semantics<parallel>], iteration_bounds = array<i64: 1>, scalar_prefetch = 0 : i64, scratch_operands = 0 : i64, tpu.core_type = #tpu.core_type<tc>, window_params = [{transform_indices = @transform_0, window_bounds = array<i64: 2, 128>}, {pipeline_mode = #tpu.pipeline_mode<synchronous>, transform_indices = @transform_1, window_bounds = array<i64: 64, 2>}, {pipeline_mode = #tpu.pipeline_mode<synchronous>, transform_indices = @transform_2, window_bounds = array<i64: 64, 1>}, {pipeline_mode = #tpu.pipeline_mode<synchronous>, transform_indices = @transform_3, window_bounds = array<i64: 64, 64>}, {pipeline_mode = #tpu.pipeline_mode<synchronous>, transform_indices = @transform_4, window_bounds = array<i64: 64, 1>}, {pipeline_mode = #tpu.pipeline_mode<synchronous>, transform_indices = @transform_5, window_bounds = array<i64: 64, 64>}, {pipeline_mode = #tpu.pipeline_mode<synchronous>, transform_indices = @transform_6, window_bounds = array<i64: 64, 1>}, {pipeline_mode = #tpu.pipeline_mode<synchronous>, transform_indices = @transform_7, window_bounds = array<i64: 32, 64>}, {pipeline_mode = #tpu.pipeline_mode<synchronous>, transform_indices = @transform_8, window_bounds = array<i64: 32, 1>}, {pipeline_mode = #tpu.pipeline_mode<synchronous>, transform_indices = @transform_9, window_bounds = array<i64: 8, 32>}, {pipeline_mode = #tpu.pipeline_mode<synchronous>, transform_indices = @transform_10, window_bounds = array<i64: 8, 1>}, {transform_indices = @transform_11, window_bounds = array<i64: 8, 128>}]} {
    %c0 = arith.constant 0 : index
    %c0_0 = arith.constant 0 : index
    %0 = vector.load %arg1[%c0, %c0_0] : memref<2x128xf32, #tpu.memory_space<vmem>>, vector<2x128xf32>
    %c0_1 = arith.constant 0 : index
    %c0_2 = arith.constant 0 : index
    %1 = vector.load %arg2[%c0_1, %c0_2] : memref<64x2xf32, #tpu.memory_space<vmem>>, vector<64x1xf32>
    %2 = vector.extract_strided_slice %0 {offsets = [0, 0], sizes = [1, 128], strides = [1, 1]} : vector<2x128xf32> to vector<1x128xf32>
    %3 = vector.broadcast %1 : vector<64x1xf32> to vector<64x128xf32>
    %4 = vector.broadcast %2 : vector<1x128xf32> to vector<64x128xf32>
    %5 = arith.mulf %3, %4 : vector<64x128xf32>
    %c0_3 = arith.constant 0 : index
    %c1 = arith.constant 1 : index
    %6 = vector.load %arg2[%c0_3, %c1] : memref<64x2xf32, #tpu.memory_space<vmem>>, vector<64x1xf32>
    %7 = vector.extract_strided_slice %0 {offsets = [1, 0], sizes = [1, 128], strides = [1, 1]} : vector<2x128xf32> to vector<1x128xf32>
    %8 = vector.broadcast %6 : vector<64x1xf32> to vector<64x128xf32>
    %9 = vector.broadcast %7 : vector<1x128xf32> to vector<64x128xf32>
    %10 = arith.mulf %8, %9 : vector<64x128xf32>
    %11 = arith.addf %5, %10 : vector<64x128xf32>
    %c0_4 = arith.constant 0 : index
    %c0_5 = arith.constant 0 : index
    %12 = vector.load %arg3[%c0_4, %c0_5] : memref<64x1xf32, #tpu.memory_space<vmem>>, vector<64x1xf32>
    %13 = vector.broadcast %12 : vector<64x1xf32> to vector<64x128xf32>
    %14 = arith.addf %11, %13 : vector<64x128xf32>
    %cst = arith.constant 0.00999999977 : f32
    %15 = vector.broadcast %cst : f32 to vector<64x128xf32>
    %16 = arith.mulf %15, %14 : vector<64x128xf32>
    %17 = arith.maximumf %14, %16 : vector<64x128xf32>
    %c0_6 = arith.constant 0 : index
    %c0_7 = arith.constant 0 : index
    %18 = vector.load %arg4[%c0_6, %c0_7] : memref<64x64xbf16, #tpu.memory_space<vmem>>, vector<64x64xbf16>
    %19 = arith.truncf %17 : vector<64x128xf32> to vector<64x128xbf16>
    %cst_8 = arith.constant dense<0.000000e+00> : vector<64x128xf32>
    %20 = tpu.matmul %18, %19, %cst_8 {dimension_numbers = #tpu.dot_dimension_numbers<[1], [0], [0], [1], [0, 0, 1, 1], [], []>} : vector<64x64xbf16>, vector<64x128xbf16>, vector<64x128xf32> -> vector<64x128xf32>
    %c0_9 = arith.constant 0 : index
    %c0_10 = arith.constant 0 : index
    %21 = vector.load %arg5[%c0_9, %c0_10] : memref<64x1xf32, #tpu.memory_space<vmem>>, vector<64x1xf32>
    %22 = vector.broadcast %21 : vector<64x1xf32> to vector<64x128xf32>
    %23 = arith.addf %20, %22 : vector<64x128xf32>
    %cst_11 = arith.constant 0.00999999977 : f32
    %24 = vector.broadcast %cst_11 : f32 to vector<64x128xf32>
    %25 = arith.mulf %24, %23 : vector<64x128xf32>
    %26 = arith.maximumf %23, %25 : vector<64x128xf32>
    %c0_12 = arith.constant 0 : index
    %c0_13 = arith.constant 0 : index
    %27 = vector.load %arg6[%c0_12, %c0_13] : memref<64x64xbf16, #tpu.memory_space<vmem>>, vector<64x64xbf16>
    %28 = arith.truncf %26 : vector<64x128xf32> to vector<64x128xbf16>
    %cst_14 = arith.constant dense<0.000000e+00> : vector<64x128xf32>
    %29 = tpu.matmul %27, %28, %cst_14 {dimension_numbers = #tpu.dot_dimension_numbers<[1], [0], [0], [1], [0, 0, 1, 1], [], []>} : vector<64x64xbf16>, vector<64x128xbf16>, vector<64x128xf32> -> vector<64x128xf32>
    %c0_15 = arith.constant 0 : index
    %c0_16 = arith.constant 0 : index
    %30 = vector.load %arg7[%c0_15, %c0_16] : memref<64x1xf32, #tpu.memory_space<vmem>>, vector<64x1xf32>
    %31 = vector.broadcast %30 : vector<64x1xf32> to vector<64x128xf32>
    %32 = arith.addf %29, %31 : vector<64x128xf32>
    %cst_17 = arith.constant 0.00999999977 : f32
    %33 = vector.broadcast %cst_17 : f32 to vector<64x128xf32>
    %34 = arith.mulf %33, %32 : vector<64x128xf32>
    %35 = arith.maximumf %32, %34 : vector<64x128xf32>
    %c0_18 = arith.constant 0 : index
    %c0_19 = arith.constant 0 : index
    %36 = vector.load %arg8[%c0_18, %c0_19] : memref<32x64xbf16, #tpu.memory_space<vmem>>, vector<32x64xbf16>
    %37 = arith.truncf %35 : vector<64x128xf32> to vector<64x128xbf16>
    %cst_20 = arith.constant dense<0.000000e+00> : vector<32x128xf32>
    %38 = tpu.matmul %36, %37, %cst_20 {dimension_numbers = #tpu.dot_dimension_numbers<[1], [0], [0], [1], [0, 0, 1, 1], [], []>} : vector<32x64xbf16>, vector<64x128xbf16>, vector<32x128xf32> -> vector<32x128xf32>
    %c0_21 = arith.constant 0 : index
    %c0_22 = arith.constant 0 : index
    %39 = vector.load %arg9[%c0_21, %c0_22] : memref<32x1xf32, #tpu.memory_space<vmem>>, vector<32x1xf32>
    %40 = vector.broadcast %39 : vector<32x1xf32> to vector<32x128xf32>
    %41 = arith.addf %38, %40 : vector<32x128xf32>
    %cst_23 = arith.constant 0.00999999977 : f32
    %42 = vector.broadcast %cst_23 : f32 to vector<32x128xf32>
    %43 = arith.mulf %42, %41 : vector<32x128xf32>
    %44 = arith.maximumf %41, %43 : vector<32x128xf32>
    %c0_24 = arith.constant 0 : index
    %c0_25 = arith.constant 0 : index
    %45 = vector.load %arg10[%c0_24, %c0_25] : memref<8x32xbf16, #tpu.memory_space<vmem>>, vector<8x32xbf16>
    %46 = arith.truncf %44 : vector<32x128xf32> to vector<32x128xbf16>
    %cst_26 = arith.constant dense<0.000000e+00> : vector<8x128xf32>
    %47 = tpu.matmul %45, %46, %cst_26 {dimension_numbers = #tpu.dot_dimension_numbers<[1], [0], [0], [1], [0, 0, 1, 1], [], []>} : vector<8x32xbf16>, vector<32x128xbf16>, vector<8x128xf32> -> vector<8x128xf32>
    %c0_27 = arith.constant 0 : index
    %c0_28 = arith.constant 0 : index
    %48 = vector.load %arg11[%c0_27, %c0_28] : memref<8x1xf32, #tpu.memory_space<vmem>>, vector<8x1xf32>
    %49 = vector.broadcast %48 : vector<8x1xf32> to vector<8x128xf32>
    %50 = arith.addf %47, %49 : vector<8x128xf32>
    %c0_29 = arith.constant 0 : index
    %c0_30 = arith.constant 0 : index
    %51 = vector.load %arg12[%c0_29, %c0_30] : memref<8x128xf32, #tpu.memory_space<vmem>>, vector<8x128xf32>
    tpu.vector_store %arg12[%c0_29, %c0_30], %50 {strides = array<i32>} : memref<8x128xf32, #tpu.memory_space<vmem>>, vector<8x128xf32>,
    return
  }
  func.func @transform_0(%arg0: i32) -> (i32, i32) {
    %c0_i32 = arith.constant 0 : i32
    %c0_i32_0 = arith.constant 0 : i32
    return %c0_i32, %arg0 : i32, i32
  }
  func.func @transform_1(%arg0: i32) -> (i32, i32) {
    %c0_i32 = arith.constant 0 : i32
    %c0_i32_0 = arith.constant 0 : i32
    %c0_i32_1 = arith.constant 0 : i32
    return %c0_i32, %c0_i32_0 : i32, i32
  }
  func.func @transform_2(%arg0: i32) -> (i32, i32) {
    %c0_i32 = arith.constant 0 : i32
    %c0_i32_0 = arith.constant 0 : i32
    %c0_i32_1 = arith.constant 0 : i32
    return %c0_i32, %c0_i32_0 : i32, i32
  }
  func.func @transform_3(%arg0: i32) -> (i32, i32) {
    %c0_i32 = arith.constant 0 : i32
    %c0_i32_0 = arith.constant 0 : i32
    %c0_i32_1 = arith.constant 0 : i32
    return %c0_i32, %c0_i32_0 : i32, i32
  }
  func.func @transform_4(%arg0: i32) -> (i32, i32) {
    %c0_i32 = arith.constant 0 : i32
    %c0_i32_0 = arith.constant 0 : i32
    %c0_i32_1 = arith.constant 0 : i32
    return %c0_i32, %c0_i32_0 : i32, i32
  }
  func.func @transform_5(%arg0: i32) -> (i32, i32) {
    %c0_i32 = arith.constant 0 : i32
    %c0_i32_0 = arith.constant 0 : i32
    %c0_i32_1 = arith.constant 0 : i32
    return %c0_i32, %c0_i32_0 : i32, i32
  }
  func.func @transform_6(%arg0: i32) -> (i32, i32) {
    %c0_i32 = arith.constant 0 : i32
    %c0_i32_0 = arith.constant 0 : i32
    %c0_i32_1 = arith.constant 0 : i32
    return %c0_i32, %c0_i32_0 : i32, i32
  }
  func.func @transform_7(%arg0: i32) -> (i32, i32) {
    %c0_i32 = arith.constant 0 : i32
    %c0_i32_0 = arith.constant 0 : i32
    %c0_i32_1 = arith.constant 0 : i32
    return %c0_i32, %c0_i32_0 : i32, i32
  }
  func.func @transform_8(%arg0: i32) -> (i32, i32) {
    %c0_i32 = arith.constant 0 : i32
    %c0_i32_0 = arith.constant 0 : i32
    %c0_i32_1 = arith.constant 0 : i32
    return %c0_i32, %c0_i32_0 : i32, i32
  }
  func.func @transform_9(%arg0: i32) -> (i32, i32) {
    %c0_i32 = arith.constant 0 : i32
    %c0_i32_0 = arith.constant 0 : i32
    %c0_i32_1 = arith.constant 0 : i32
    return %c0_i32, %c0_i32_0 : i32, i32
  }
  func.func @transform_10(%arg0: i32) -> (i32, i32) {
    %c0_i32 = arith.constant 0 : i32
    %c0_i32_0 = arith.constant 0 : i32
    %c0_i32_1 = arith.constant 0 : i32
    return %c0_i32, %c0_i32_0 : i32, i32
  }
  func.func @transform_11(%arg0: i32) -> (i32, i32) {
    %c0_i32 = arith.constant 0 : i32
    %c0_i32_0 = arith.constant 0 : i32
    return %c0_i32, %arg0 : i32, i32
  }
}

</mosaic_0001>

<bundles_post_ra>
// kernel: tpu_custom_call.1
= control target key start
LH: loop header
LB: loop body
LE: loop exit
PB: predicated region body
PF: predicated region fallthrough
CT: control target
= control target key end

     0   :  { %v892_v2 = vmov 1   ;;  %v893_v7 = vmov 0   ;;  %s1126_s0 = inlined_call_operand.vmem [shape: f32[2,128], index: 0, kind: input, shape index: {}]   ;;  %s1127_s1 = inlined_call_operand.vmem [shape: f32[64,2], index: 1, kind: input, shape index: {}]   ;;  %s1128_s2 = inlined_call_operand.vmem [shape: f32[64,1], index: 2, kind: input, shape index: {}]   ;;  %s1129_s3 = inlined_call_operand.vmem [shape: bf16[64,64], index: 3, kind: input, shape index: {}]   ;;  %s1130_s4 = inlined_call_operand.vmem [shape: f32[64,1], index: 4, kind: input, shape index: {}]   ;;  %s1131_s5 = inlined_call_operand.vmem [shape: bf16[64,64], index: 5, kind: input, shape index: {}]   ;;  %s1132_s6 = inlined_call_operand.vmem [shape: f32[64,1], index: 6, kind: input, shape index: {}]   ;;  %s1133_s7 = inlined_call_operand.vmem [shape: bf16[32,64], index: 7, kind: input, shape index: {}]   ;;  %s1134_s8 = inlined_call_operand.vmem [shape: f32[32,1], index: 8, kind: input, shape index: {}]   ;;  %s1135_s9 = inlined_call_operand.vmem [shape: bf16[8,32], index: 9, kind: input, shape index: {}]   ;;  %s1136_s10 = inlined_call_operand.vmem [shape: f32[8,1], index: 10, kind: input, shape index: {}]   ;;  %s1137_s11 = inlined_call_operand.hbm [shape: f32[8,128], index: 11, kind: output, shape index: {}]  }
   0x1   :  { %v43_v0 = vld [vmem:[%s1127_s1 + $0x10] sm:$0xff]  ;;  %v41_v1 = vld [vmem:[%s1127_s1] sm:$0xff]  ;;  %850 = vset.pattern.permute.xlu0 %v892_v2  ;;  %848 = vset.pattern.permute.xlu1 %v892_v2  ;;  %v42_v4 = vld [vmem:[%s1127_s1 + $0x8] sm:$0xff] }
   0x2   :  { %110 = vperm.xlu0 %850, %v43_v0   ;;  %102 = vperm.xlu1 %848, %v41_v1   ;;  %v45_v3 = vld [vmem:[%s1127_s1 + $0x20] sm:$0xff]  ;;  %v47_v5 = vld [vmem:[%s1127_s1 + $0x30] sm:$0xff]  ;;  %v44_v6 = vld [vmem:[%s1127_s1 + $0x18] sm:$0xff] }
   0x3   :  { %v153_v8 = vld [vmem:[%s1128_s2] sm:$0xff] }
   0x6   :  { %118 = vperm.xlu0 %850, %v45_v3   ;;  %106 = vperm.xlu1 %848, %v42_v4  }
   0xa   :  { %126 = vperm.xlu0 %850, %v47_v5   ;;  %849 = vset.pattern.permute.xlu1 %v893_v7 }
   0xb   :  { %66 = vperm.xlu1 %849, %v44_v6  }
   0xe   :  { %855 = vset.pattern.permute.xlu0 %v893_v7 }
   0xf   :  { %51 = vperm.xlu0 %855, %v41_v1   ;;  %851 = vset.pattern.permute.xlu1 %v892_v2 }
  0x10   :  { %114 = vperm.xlu1 %851, %v44_v6  }
  0x13   :  { %56 = vperm.xlu0 %855, %v42_v4  }
  0x14   :  { %16 = vsyncpa [#allocation3], 0  ;;  %852 = vset.pattern.permute.xlu1 %v893_v7  ;;  %v154_v9 = vld [vmem:[%s1128_s2 + $0x8] sm:$0xff]  ;;  %v156_v11 = vld [vmem:[%s1128_s2 + $0x18] sm:$0xff]  ;;  %vm305_vm0 = vcmask 523264   ;;  %v89_v42 = vlaneseq  ;;  %vm895_vm1 = vmmov 0  }
  0x15   :  { %163 = vperm.xlu1 %852, %v153_v8   ;;  %v46_v10 = vld [vmem:[%s1127_s1 + $0x28] sm:$0xff]  ;;  %v237_v13 = vld [vmem:[%s1130_s4] sm:$0xff]  ;;  %v155_v14 = vld [vmem:[%s1128_s2 + $0x10] sm:$0xff]  ;;  %vm686_vm2 = vcmask 261120   ;;  %s896_s25 = smov [#allocation2]  }
  0x16   :  { %v158_v12 = vld [vmem:[%s1128_s2 + $0x28] sm:$0xff]  ;;  %v239_v15 = vld [vmem:[%s1130_s4 + $0x10] sm:$0xff]  ;;  %v241_v16 = vld [vmem:[%s1130_s4 + $0x20] sm:$0xff]  ;;  %v90_v45 = vshrl.u32 %v89_v42, 7  ;;  %s737_s26 = sshll.u32 %s896_s25, 4  ;;  %s738_s26 = int_to_ptr.vmem [resolvable:$true] %s737_s26 }
  0x17   :  { %61 = vperm.xlu0 %855, %v43_v0   ;;  %v48_v17 = vld [vmem:[%s1127_s1 + $0x38] sm:$0xff]  ;;  %v243_v18 = vld [vmem:[%s1130_s4 + $0x30] sm:$0xff]  ;;  %v411_v19 = vld [vmem:[%s1132_s6] sm:$0xff]  ;;  %s868_s27 = scalar_lea.vmem %s738_s26, 128  ;;  %p873_p1 = scmp.lt.s32.totalorder %s738_s26, %s738_s26 }
  0x18   :  { %v157_v20 = vld [vmem:[%s1128_s2 + $0x20] sm:$0xff]  ;;  %v413_v21 = vld [vmem:[%s1132_s6 + $0x10] sm:$0xff]  ;;  %v160_v24 = vld [vmem:[%s1128_s2 + $0x38] sm:$0xff]  ;;  %v135_v48 = vsub.s32 1, %v90_v45  ;;  %v91_v49 = vsub.s32 0, %v90_v45  ;;  %p869_p0 = scmp.ne.s32.totalorder %s738_s26, %s868_s27  ;;  %p874_p2 = scmp.lt.s32.totalorder %s868_s27, %s868_s27 }
  0x19   :  { %71 = vperm.xlu1 %852, %v45_v3   ;;  %v159_v22 = vld [vmem:[%s1128_s2 + $0x30] sm:$0xff]  ;;  %v415_v23 = vld [vmem:[%s1132_s6 + $0x20] sm:$0xff]  ;;  %v238_v26 = vld [vmem:[%s1130_s4 + $0x8] sm:$0xff] }
  0x1a   :  { %v417_v25 = vld [vmem:[%s1132_s6 + $0x30] sm:$0xff]  ;;  %v580_v27 = vld [vmem:[%s1134_s8] sm:$0xff]  ;;  %v240_v28 = vld [vmem:[%s1130_s4 + $0x18] sm:$0xff]  ;;  %p875_p3 = por %p874_p2, %p873_p1 }
  0x1b   :  { %168 = vperm.xlu0 %855, %v154_v9   ;;  %v582_v29 = vld [vmem:[%s1134_s8 + $0x10] sm:$0xff]  ;;  %v242_v30 = vld [vmem:[%s1130_s4 + $0x28] sm:$0xff]  ;;  %v858_v31 = vld [vmem:[%s1129_s3] sm:$0xff]  }
  0x1c   :  { %v680_v32 = vld [vmem:[%s1136_s10] sm:$0xff]  ;;  %799 = vmatprep.mubr.msk.bf16.mxu0 %vm305_vm0, %v858_v31  ;;  %v244_v33 = vld [vmem:[%s1130_s4 + $0x38] sm:$0xff]  ;;  %v412_v34 = vld [vmem:[%s1132_s6 + $0x8] sm:$0xff]  ;;  %p876_p4 = pnand %p875_p3, %p869_p0 }
  0x1d   :  { %76 = vperm.xlu1 %852, %v46_v10   ;;  %v414_v35 = vld [vmem:[%s1132_s6 + $0x18] sm:$0xff]  ;;  %v416_v36 = vld [vmem:[%s1132_s6 + $0x28] sm:$0xff]  ;;  %v40_v50 = vld [vmem:[%s1126_s0] sm:$0x3] }
  0x1e   :  { %v418_v37 = vld [vmem:[%s1132_s6 + $0x38] sm:$0xff]  ;;  %v581_v38 = vld [vmem:[%s1134_s8 + $0x8] sm:$0xff]  ;;  %v136_v52 = vrot.slane %v40_v50, %v135_v48  ;;  %v92_v53 = vrot.slane %v40_v50, %v91_v49 }
  0x1f   :  { %178 = vperm.xlu0 %855, %v156_v11   ;;  %v583_v39 = vld [vmem:[%s1134_s8 + $0x18] sm:$0xff] }
  0x21   :  { %853 = vset.pattern.permute.xlu1 %v892_v2 }
  0x22   :  { %122 = vperm.xlu1 %853, %v46_v10  }
  0x23   :  { %188 = vperm.xlu0 %855, %v158_v12  }
  0x26   :  { %854 = vset.pattern.permute.xlu1 %v893_v7 }
  0x27   :  { %247 = vperm.xlu0 %855, %v237_v13   ;;  %173 = vperm.xlu1 %854, %v155_v14  }
  0x2b   :  { %257 = vperm.xlu0 %855, %v239_v15   ;;  %81 = vperm.xlu1 %854, %v47_v5  }
  0x2f   :  { %267 = vperm.xlu0 %855, %v241_v16   ;;  %86 = vperm.xlu1 %854, %v48_v17  }
  0x33   :  { %277 = vperm.xlu0 %855, %v243_v18   ;;  %856 = vset.pattern.permute.xlu1 %v892_v2 }
  0x34   :  { %130 = vperm.xlu1 %856, %v48_v17  }
  0x37   :  { %421 = vperm.xlu0 %855, %v411_v19  }
  0x38   :  { %857 = vset.pattern.permute.xlu1 %v893_v7 }
  0x39   :  { %183 = vperm.xlu1 %857, %v157_v20  }
  0x3b   :  { %431 = vperm.xlu0 %855, %v413_v21  }
  0x3d   :  { %193 = vperm.xlu1 %857, %v159_v22  }
  0x3f   :  { %441 = vperm.xlu0 %855, %v415_v23  }
  0x41   :  { %198 = vperm.xlu1 %857, %v160_v24  }
  0x43   :  { %451 = vperm.xlu0 %855, %v417_v25  }
  0x45   :  { %252 = vperm.xlu1 %857, %v238_v26  }
  0x47   :  { %586 = vperm.xlu0 %855, %v580_v27  }
  0x49   :  { %262 = vperm.xlu1 %857, %v240_v28  }
  0x4b   :  { %596 = vperm.xlu0 %855, %v582_v29  }
  0x4d   :  { %272 = vperm.xlu1 %857, %v242_v30  }
  0x4f   :  { %683 = vperm.xlu0 %855, %v680_v32  }
  0x51   :  { %282 = vperm.xlu1 %857, %v244_v33  }
  0x55   :  { %426 = vperm.xlu1 %857, %v412_v34  }
  0x59   :  { %436 = vperm.xlu1 %857, %v414_v35  }
  0x5d   :  { %446 = vperm.xlu1 %857, %v416_v36  }
  0x61   :  { %456 = vperm.xlu1 %857, %v418_v37  }
  0x65   :  { %591 = vperm.xlu1 %857, %v581_v38  }
  0x69   :  { %601 = vperm.xlu1 %857, %v583_v39  }
  0x81   :  { %v103_v40 = vpop.permute.xlu1 %102  ;;  %v111_v41 = vpop.permute.xlu0 %110 }
  0x82   :  { %v137_v57 = vmul.f32 %v136_v52, %v103_v40  ;;  %v139_v12 = vmul.f32 %v136_v52, %v111_v41 }
  0x85   :  { %v107_v43 = vpop.permute.xlu1 %106  ;;  %v119_v44 = vpop.permute.xlu0 %118 }
  0x86   :  { %v138_v62 = vmul.f32 %v136_v52, %v107_v43  ;;  %v141_v31 = vmul.f32 %v136_v52, %v119_v44 }
  0x89   :  { %v127_v46 = vpop.permute.xlu0 %126 }
  0x8a   :  { %v67_v47 = vpop.permute.xlu1 %66  ;;  %v143_v39 = vmul.f32 %v136_v52, %v127_v46 }
  0x8b   :  { %v96_v8 = vmul.f32 %v92_v53, %v67_v47 }
  0x8e   :  { %v52_v51 = vpop.permute.xlu0 %51 }
  0x8f   :  { %v115_v54 = vpop.permute.xlu1 %114  ;;  %v93_v55 = vmul.f32 %v92_v53, %v52_v51 }
  0x90   :  { %v140_v6 = vmul.f32 %v136_v52, %v115_v54 }
  0x91   :  { %v145_v60 = vadd.f32 %v137_v57, %v93_v55 }
  0x92   :  { %v57_v56 = vpop.permute.xlu0 %56  ;;  %v148_v14 = vadd.f32 %v140_v6, %v96_v8 }
  0x93   :  { %v94_v59 = vmul.f32 %v92_v53, %v57_v56 }
  0x94   :  { %v164_v58 = vpop.permute.xlu1 %163 }
  0x95   :  { %v201_v63 = vadd.f32 %v164_v58, %v145_v60  ;;  %v146_v1 = vadd.f32 %v138_v62, %v94_v59  ;;  %v862_v62 = vld [vmem:[%s1131_s5] sm:$0xff]  }
  0x96   :  { %v62_v61 = vpop.permute.xlu0 %61  ;;  %815 = vmatprep.mubr.msk.bf16.mxu1 %vm305_vm0, %v862_v62 }
  0x97   :  { %v209_v3 = vmul.f32 0.01, %v201_v63  ;;  %v95_v13 = vmul.f32 %v92_v53, %v62_v61  ;;  %v861_v61 = vld [vmem:[%s1129_s3 + $0x18] sm:$0xff]  }
  0x98   :  { %v72_v0 = vpop.permute.xlu1 %71 }
  0x99   :  { %v217_v9 = vmax.f32 %v201_v63, %v209_v3  ;;  %v147_v18 = vadd.f32 %v139_v12, %v95_v13  ;;  %v97_v32 = vmul.f32 %v92_v53, %v72_v0 }
  0x9a   :  { %v169_v2 = vpop.permute.xlu0 %168 }
  0x9b   :  { %v202_v4 = vadd.f32 %v169_v2, %v146_v1  ;;  %v149_v37 = vadd.f32 %v141_v31, %v97_v32 }
  0x9c   :  { %v77_v5 = vpop.permute.xlu1 %76 }
  0x9d   :  { %v210_v7 = vmul.f32 0.01, %v202_v4  ;;  %v98_v29 = vmul.f32 %v92_v53, %v77_v5 }
  0x9e   :  { %v179_v11 = vpop.permute.xlu0 %178 }
  0x9f   :  { %v218_v10 = vmax.f32 %v202_v4, %v210_v7  ;;  %v204_v17 = vadd.f32 %v179_v11, %v148_v14 }
  0xa1   :  { %v123_v15 = vpop.permute.xlu1 %122  ;;  %v233_v16 = vpack.c.bf16 %v218_v10, %v217_v9  ;;  %v212_v20 = vmul.f32 0.01, %v204_v17 }
  0xa2   :  { %v142_v26 = vmul.f32 %v136_v52, %v123_v15  ;;  %v189_v34 = vpop.permute.xlu0 %188 }
  0xa3   :  { %791 = vmatprep.subr.bf16.mxu0 %v233_v16  ;;  %v220_v24 = vmax.f32 %v204_v17, %v212_v20 }
  0xa4   :  { %792 = vmatpush3.bf16.msra.mxu0 %v233_v16  ;;  %v150_v30 = vadd.f32 %v142_v26, %v98_v29 }
  0xa6   :  { %v174_v19 = vpop.permute.xlu1 %173  ;;  %v206_v35 = vadd.f32 %v189_v34, %v150_v30  ;;  %v248_v63 = vpop.permute.xlu0 %247 }
  0xa7   :  { %v203_v21 = vadd.f32 %v174_v19, %v147_v18 }
  0xa8   :  { %v214_v40 = vmul.f32 0.01, %v206_v35 }
  0xa9   :  { %v211_v22 = vmul.f32 0.01, %v203_v21 }
  0xaa   :  { %v82_v23 = vpop.permute.xlu1 %81  ;;  %v222_v48 = vmax.f32 %v206_v35, %v214_v40  ;;  %v258_v1 = vpop.permute.xlu0 %257 }
  0xab   :  { %v219_v25 = vmax.f32 %v203_v21, %v211_v22  ;;  %v99_v36 = vmul.f32 %v92_v53, %v82_v23 }
  0xad   :  { %v234_v27 = vpack.c.bf16 %v220_v24, %v219_v25  ;;  %v151_v45 = vadd.f32 %v143_v39, %v99_v36 }
  0xae   :  { %v87_v28 = vpop.permute.xlu1 %86  ;;  %v268_v6 = vpop.permute.xlu0 %267 }
  0xaf   :  { %793 = vmatprep.subr.bf16.mxu0 %v234_v27  ;;  %v100_v49 = vmul.f32 %v92_v53, %v87_v28  ;;  %v860_v53 = vld [vmem:[%s1129_s3 + $0x10] sm:$0xff]  }
  0xb0   :  { %794 = vmatpush3.bf16.msra.mxu0 %v234_v27 }
  0xb2   :  { %v278_v19 = vpop.permute.xlu0 %277 }
  0xb3   :  { %v131_v33 = vpop.permute.xlu1 %130 }
  0xb4   :  { %v144_v42 = vmul.f32 %v136_v52, %v131_v33  ;;  %v859_v52 = vld [vmem:[%s1129_s3 + $0x8] sm:$0xff]  }
  0xb6   :  { %v152_v54 = vadd.f32 %v144_v42, %v100_v49  ;;  %v422_v49 = vpop.permute.xlu0 %421 }
  0xb8   :  { %v184_v38 = vpop.permute.xlu1 %183 }
  0xb9   :  { %v205_v41 = vadd.f32 %v184_v38, %v149_v37 }
  0xbb   :  { %v213_v43 = vmul.f32 0.01, %v205_v41 }
  0xbc   :  { %v194_v47 = vpop.permute.xlu1 %193 }
  0xbd   :  { %v221_v50 = vmax.f32 %v205_v41, %v213_v43  ;;  %v207_v51 = vadd.f32 %v194_v47, %v151_v45  ;;  %v863_v43 = vld [vmem:[%s1131_s5 + $0x8] sm:$0xff]   ;;  %v864_v45 = vld [vmem:[%s1131_s5 + $0x10] sm:$0xff]   ;;  %v865_v47 = vld [vmem:[%s1131_s5 + $0x18] sm:$0xff]  }
  0xbf   :  { %v235_v44 = vpack.c.bf16 %v222_v48, %v221_v50  ;;  %v215_v56 = vmul.f32 0.01, %v207_v51  ;;  %v866_v48 = vld [vmem:[%s1133_s7] sm:$0xff]  }
  0xc0   :  { %v199_v55 = vpop.permute.xlu1 %198 }
  0xc1   :  { %v208_v57 = vadd.f32 %v199_v55, %v152_v54  ;;  %795 = vmatprep.subr.bf16.mxu0 %v235_v44  ;;  %v223_v59 = vmax.f32 %v207_v51, %v215_v56  ;;  %v432_v51 = vpop.permute.xlu0 %431 }
  0xc2   :  { %796 = vmatpush3.bf16.msra.mxu0 %v235_v44 }
  0xc3   :  { %v216_v58 = vmul.f32 0.01, %v208_v57 }
  0xc4   :  { %v253_v0 = vpop.permute.xlu1 %252 }
  0xc5   :  { %v224_v46 = vmax.f32 %v208_v57, %v216_v58  ;;  %v442_v57 = vpop.permute.xlu0 %441 }
  0xc7   :  { %v236_v60 = vpack.c.bf16 %v224_v46, %v223_v59 }
  0xc8   :  { %v263_v2 = vpop.permute.xlu1 %262 }
  0xc9   :  { %797 = vmatprep.subr.bf16.mxu0 %v236_v60 }
  0xca   :  { %798 = vmatpush3.bf16.msra.mxu0 %v236_v60 }
  0xcc   :  { %v273_v12 = vpop.permute.xlu1 %272 }
  0xcd   :  { %800 = vmatmul.mubr.msk.bf16.vlgmr.msra.gmra.mrb[0].mxu0 %vm305_vm0, %v859_v52 }
  0xce   :  { %803 = vmatprep.mubr.msk.bf16.mxu0 %vm305_vm0, %v860_v53 }
  0xd0   :  { %v283_v26 = vpop.permute.xlu1 %282 }
  0xd4   :  { %v427_v50 = vpop.permute.xlu1 %426 }
  0xd5   :  { %804 = vmatmul.mubr.msk.bf16.gmra.mrb[4].mxu0 %vm305_vm0, %v861_v61 }
  0xd6   :  { %831 = vmatprep.mubr.msk.bf16.mxu0 %vm305_vm0, %v866_v48 }
  0xd8   :  { %v437_v54 = vpop.permute.xlu1 %436 }
  0xdc   :  { %v447_v53 = vpop.permute.xlu1 %446 }
 0x1a0   :  { %v801_v3 = vpop.f32.mrb[0].mxu0 }
 0x1a1   :  { %v361_v4 = vadd.f32 %v801_v3, %v258_v1  ;;  %v352_v5 = vpop.f32.mrb[1].mxu0  ;;  %v452_v3 = vpop.permute.xlu0 %451 }
 0x1a2   :  { %v353_v7 = vadd.f32 %v352_v5, %v248_v63  ;;  %v802_v8 = vpop.f32.mrb[2].mxu0 }
 0x1a3   :  { %v385_v9 = vmul.f32 0.01, %v361_v4  ;;  %v364_v10 = vadd.f32 %v802_v8, %v263_v2  ;;  %v355_v11 = vpop.f32.mrb[3].mxu0 }
 0x1a4   :  { %v383_v13 = vmul.f32 0.01, %v353_v7  ;;  %v356_v14 = vadd.f32 %v355_v11, %v253_v0 }
 0x1a5   :  { %v386_v15 = vmul.f32 0.01, %v364_v10  ;;  %v393_v17 = vmax.f32 %v361_v4, %v385_v9 }
 0x1a6   :  { %v384_v16 = vmul.f32 0.01, %v356_v14  ;;  %v391_v20 = vmax.f32 %v353_v7, %v383_v13 }
 0x1a7   :  { %v394_v18 = vmax.f32 %v364_v10, %v386_v15  ;;  %v457_v10 = vpop.permute.xlu1 %456 }
 0x1a8   :  { %v392_v21 = vmax.f32 %v356_v14, %v384_v16  ;;  %v805_v22 = vpop.f32.mrb[4].mxu0 }
 0x1a9   :  { %v377_v23 = vadd.f32 %v805_v22, %v278_v19  ;;  %v368_v24 = vpop.f32.mrb[5].mxu0  ;;  %v408_v25 = vpack.c.bf16 %v394_v18, %v393_v17 }
 0x1aa   :  { %v369_v27 = vadd.f32 %v368_v24, %v268_v6  ;;  %v806_v28 = vpop.f32.mrb[6].mxu0  ;;  %v407_v29 = vpack.c.bf16 %v392_v21, %v391_v20 }
 0x1ab   :  { %v389_v30 = vmul.f32 0.01, %v377_v23  ;;  %v380_v31 = vadd.f32 %v806_v28, %v283_v26  ;;  %v371_v32 = vpop.f32.mrb[7].mxu0  ;;  %v894_v28 = vmov 0.0  }
 0x1ac   :  { %v387_v33 = vmul.f32 0.01, %v369_v27  ;;  %v372_v34 = vadd.f32 %v371_v32, %v273_v12  ;;  %807 = vmatprep.subr.bf16.mxu1 %v407_v29 }
 0x1ad   :  { %v390_v35 = vmul.f32 0.01, %v380_v31  ;;  %808 = vmatpush3.bf16.msra.mxu1 %v407_v29  ;;  %v397_v37 = vmax.f32 %v377_v23, %v389_v30  ;;  %v587_v29 = vpop.permute.xlu0 %586  ;;  %v592_v30 = vpop.permute.xlu1 %591 }
 0x1ae   :  { %v388_v36 = vmul.f32 0.01, %v372_v34  ;;  %809 = vmatprep.subr.bf16.mxu1 %v408_v25  ;;  %v395_v39 = vmax.f32 %v369_v27, %v387_v33  ;;  %v867_v27 = vld [vmem:[%s1133_s7 + $0x8] sm:$0xff]  }
 0x1af   :  { %v398_v38 = vmax.f32 %v380_v31, %v390_v35 }
 0x1b0   :  { %v396_v40 = vmax.f32 %v372_v34, %v388_v36 }
 0x1b1   :  { %810 = vmatpush3.bf16.msra.mxu1 %v408_v25  ;;  %v410_v41 = vpack.c.bf16 %v398_v38, %v397_v37  ;;  %v597_v31 = vpop.permute.xlu0 %596  ;;  %v602_v35 = vpop.permute.xlu1 %601 }
 0x1b2   :  { %v409_v42 = vpack.c.bf16 %v396_v40, %v395_v39 }
 0x1b4   :  { %811 = vmatprep.subr.bf16.mxu1 %v409_v42 }
 0x1b5   :  { %812 = vmatpush3.bf16.msra.mxu1 %v409_v42 }
 0x1b6   :  { %813 = vmatprep.subr.bf16.mxu1 %v410_v41 }
 0x1b9   :  { %814 = vmatpush3.bf16.msra.mxu1 %v410_v41 }
 0x1ba   :  { %835 = vmatprep.subr.bf16.mxu1 %v894_v28 }
 0x1bc   :  { %816 = vmatmul.mubr.msk.bf16.vlgmr.msra.gmra.mrb[0].mxu1 %vm305_vm0, %v863_v43 }
 0x1bd   :  { %819 = vmatprep.mubr.msk.bf16.mxu1 %vm305_vm0, %v864_v45 }
 0x1c4   :  { %820 = vmatmul.mubr.msk.bf16.gmra.mrb[4].mxu1 %vm305_vm0, %v865_v47 }
 0x1c5   :  { %839 = vmatprep.mubr.msk.bf16.mxu1 %vm895_vm1, %v894_v28 }
 0x28f   :  { %v817_v44 = vpop.f32.mrb[0].mxu1 }
 0x290   :  { %v534_v55 = vadd.f32 %v817_v44, %v432_v51  ;;  %v525_v56 = vpop.f32.mrb[1].mxu1  ;;  %v677_v44 = vld [vmem:[%s1135_s9] sm:$0xf] }
 0x291   :  { %v526_v58 = vadd.f32 %v525_v56, %v422_v49  ;;  %v818_v59 = vpop.f32.mrb[2].mxu1 }
 0x292   :  { %v558_v46 = vmul.f32 0.01, %v534_v55  ;;  %v537_v60 = vadd.f32 %v818_v59, %v437_v54  ;;  %v528_v52 = vpop.f32.mrb[3].mxu1 }
 0x293   :  { %v556_v61 = vmul.f32 0.01, %v526_v58  ;;  %v529_v62 = vadd.f32 %v528_v52, %v427_v50 }
 0x294   :  { %v559_v63 = vmul.f32 0.01, %v537_v60  ;;  %v566_v1 = vmax.f32 %v534_v55, %v558_v46  ;;  %v684_v55 = vpop.permute.xlu0 %683 }
 0x295   :  { %v557_v0 = vmul.f32 0.01, %v529_v62  ;;  %v564_v4 = vmax.f32 %v526_v58, %v556_v61 }
 0x296   :  { %v567_v2 = vmax.f32 %v537_v60, %v559_v63 }
 0x297   :  { %v565_v5 = vmax.f32 %v529_v62, %v557_v0  ;;  %v821_v6 = vpop.f32.mrb[4].mxu1 }
 0x298   :  { %v550_v7 = vadd.f32 %v821_v6, %v452_v3  ;;  %v541_v8 = vpop.f32.mrb[5].mxu1  ;;  %v577_v9 = vpack.c.bf16 %v567_v2, %v566_v1 }
 0x299   :  { %v542_v11 = vadd.f32 %v541_v8, %v442_v57  ;;  %v822_v12 = vpop.f32.mrb[6].mxu1  ;;  %v576_v13 = vpack.c.bf16 %v565_v5, %v564_v4 }
 0x29a   :  { %v562_v14 = vmul.f32 0.01, %v550_v7  ;;  %v553_v15 = vadd.f32 %v822_v12, %v457_v10  ;;  %v544_v16 = vpop.f32.mrb[7].mxu1 }
 0x29b   :  { %v560_v17 = vmul.f32 0.01, %v542_v11  ;;  %v545_v18 = vadd.f32 %v544_v16, %v447_v53  ;;  %823 = vmatprep.subr.bf16.mxu0 %v576_v13 }
 0x29c   :  { %v563_v19 = vmul.f32 0.01, %v553_v15  ;;  %824 = vmatpush3.bf16.msra.mxu0 %v576_v13  ;;  %v570_v21 = vmax.f32 %v550_v7, %v562_v14 }
 0x29d   :  { %v561_v20 = vmul.f32 0.01, %v545_v18  ;;  %825 = vmatprep.subr.bf16.mxu0 %v577_v9  ;;  %v568_v23 = vmax.f32 %v542_v11, %v560_v17 }
 0x29e   :  { %v571_v22 = vmax.f32 %v553_v15, %v563_v19 }
 0x29f   :  { %v569_v24 = vmax.f32 %v545_v18, %v561_v20 }
 0x2a0   :  { %826 = vmatpush3.bf16.msra.mxu0 %v577_v9  ;;  %v579_v25 = vpack.c.bf16 %v571_v22, %v570_v21 }
 0x2a1   :  { %v578_v26 = vpack.c.bf16 %v569_v24, %v568_v23 }
 0x2a3   :  { %827 = vmatprep.subr.bf16.mxu0 %v578_v26 }
 0x2a4   :  { %828 = vmatpush3.bf16.msra.mxu0 %v578_v26 }
 0x2a5   :  { %829 = vmatprep.subr.bf16.mxu0 %v579_v25 }
 0x2a8   :  { %830 = vmatpush3.bf16.msra.mxu0 %v579_v25 }
 0x2ab   :  { %832 = vmatmul.mubr.msk.bf16.vlgmr.msra.gmra.mrb[8].mxu0 %vm305_vm0, %v867_v27 }
 0x37e   :  { %v833_v32 = vpop.f32.mrb[8].mxu0 }
 0x37f   :  { %v663_v33 = vadd.f32 %v833_v32, %v597_v31  ;;  %v654_v34 = vpop.f32.mrb[9].mxu0 }
 0x380   :  { %v655_v36 = vadd.f32 %v654_v34, %v587_v29  ;;  %v834_v37 = vpop.f32.mrb[10].mxu0 }
 0x381   :  { %v671_v38 = vmul.f32 0.01, %v663_v33  ;;  %v666_v39 = vadd.f32 %v834_v37, %v602_v35  ;;  %v657_v40 = vpop.f32.mrb[11].mxu0 }
 0x382   :  { %v669_v41 = vmul.f32 0.01, %v655_v36  ;;  %v658_v42 = vadd.f32 %v657_v40, %v592_v30 }
 0x383   :  { %v672_v43 = vmul.f32 0.01, %v666_v39  ;;  %v675_v47 = vmax.f32 %v663_v33, %v671_v38 }
 0x384   :  { %v670_v45 = vmul.f32 0.01, %v658_v42  ;;  %v673_v49 = vmax.f32 %v655_v36, %v669_v41 }
 0x385   :  { %v676_v48 = vmax.f32 %v666_v39, %v672_v43 }
 0x386   :  { %v674_v50 = vmax.f32 %v658_v42, %v670_v45 }
 0x387   :  { %v679_v51 = vpack.c.bf16 %v676_v48, %v675_v47 }
 0x388   :  { %v678_v54 = vpack.c.bf16 %v674_v50, %v673_v49 }
 0x38a   :  { %836 = vmatpush3.bf16.msra.mxu1 %v678_v54 }
 0x38b   :  { %837 = vmatprep.subr.bf16.mxu1 %v894_v28 }
 0x38e   :  { %838 = vmatpush3.bf16.msra.mxu1 %v679_v51 }
 0x391   :  { %840 = vmatmul.mubr.msk.bf16.vlgmr.msra.gmra.mrb[8].mxu1 %vm686_vm2, %v677_v44 }
 0x464   :  { %v724_v56 = vpop.f32.mrb[8].mxu1 }
 0x465   :  { %v725_v57 = vadd.f32 %v724_v56, %v684_v55  ;;  %v841_v58 = vpop.f32.mrb[9].mxu1 }
 0x466   :  { %v727_v59 = vpop.f32.mrb[10].mxu1 }
 0x467   :  { %730 = vst [vmem:[#allocation2] sm:$0xff] %v725_v57  ;;  %v842_v46 = vpop.f32.mrb[11].mxu1 }
 0x468   :  { %879 = shalt.err (!%p876_p4)
}
 0x469   :  { %s880_s28 = scalar_lea.hbm %s1137_s11, 128 }
 0x46a   :  { %p881_p5 = scmp.ne.s32.totalorder %s1137_s11, %s880_s28  ;;  %p884_p6 = scmp.lt.u32.totalorder %s880_s28, %s1137_s11 }
 0x46c   :  { %p886_p7 = pnand %p884_p6, %p881_p5 }
 0x46e   :  { %889 = shalt.err (!%p886_p7)
}
 0x46f   :  { %740 = dma.vmem_to_hbm [thread:$0]  %s738_s26, 128, %s1137_s11, [#allocation3]  }
 0x470   :  { %890 = dma.done.wait [#allocation3], 128  }
 0x471   :  { %891 = vsyncadd [#allocation3], 4294967168 }
 0x472   :  { %744 = vsyncpa [#allocation3], 1 }

</bundles_post_ra>
